<compile_context>
chip_gen: v6e
topology: v6e:2x2x1
jax: 0.10.0
libtpu: 0.0.40
codegen_flags: <defaults>
</compile_context>

<pallas_src>
import jax
import jax.numpy as jnp
import numpy as np
from jax.experimental import pallas as pl
from jax.experimental.pallas import tpu as pltpu


# ---------------- Pallas kernel ----------------

def _make_stem_kernel(R, P, THp, Cout):
    """Fused conv(+BN)+ReLU+maxpool over one (image, pooled-row band) block.

    x_ref: (R*P, 2*K)  bf16 width-pair-packed im2col patches
    w_ref: (2*K, 2*Cout) bf16 block-diagonal (BN-scaled) weights
    b_ref: (1, 2*Cout)  f32 folded BN shift (tiled twice)
    o_ref: (THp, P, Cout) f32 pooled output rows of this band
    """

    def kernel(x_ref, w_ref, b_ref, o_ref):
        # conv (+ folded BN) + ReLU; lanes [0:Cout] = even output col,
        # lanes [Cout:2*Cout] = odd output col of each width pair.
        acc = jnp.dot(x_ref[...], w_ref[...], preferred_element_type=jnp.float32)
        y = jnp.maximum(acc + b_ref[...], 0.0)              # (R*P, 2*Cout) f32
        y3 = y.reshape(R, P, 2 * Cout)

        # --- maxpool along width (3 taps, stride 2, clipped window at the left) ---
        ev = y3[:, :, :Cout]                                # conv col 2p
        od = y3[:, :, Cout:]                                # conv col 2p+1
        od_prev = jnp.concatenate([od[:, :1, :], od[:, :P - 1, :]], axis=1)
        wpool = jnp.maximum(jnp.maximum(ev, od), od_prev)   # (R, P, Cout)

        # --- top boundary: slot 0 of band 0 is the (clipped) conv row -1 -> exclude ---
        top_pad = jnp.where(pl.program_id(1) == 0,
                            jnp.float32(-3.0e38), jnp.float32(3.0e38))
        wpool = jnp.concatenate(
            [jnp.minimum(wpool[:1], top_pad), wpool[1:]], axis=0)

        # --- maxpool along height (3 taps, stride 2) via even/odd slot split ---
        wp4 = wpool.reshape(THp + 1, 2, P, Cout)            # major-dim split (free)
        he = wp4[:, 0]                                      # slots 0, 2, ..., 2*THp
        hd = wp4[:, 1]                                      # slots 1, 3, ..., 2*THp+1
        # NOTE: final store is Cout=64 wide (half a vreg); it is a tiny stream
        # compared to the patch reads, so we keep it unpacked for simplicity.
        o_ref[...] = jnp.maximum(jnp.maximum(he[:THp], hd[:THp]), he[1:THp + 1])

    return kernel


# ---------------- Wrapper ----------------

def resnet_backbone_stem(x_nchw, conv_w, bn_gamma, bn_beta, bn_mean, bn_var,
                         eps=1e-5, pooled_rows_per_band=16):
    x_nchw = x_nchw.astype(jnp.float32)
    N, Cin, H, W = x_nchw.shape
    Cout, Cin_w, KH, KW = conv_w.shape
    assert Cin_w == Cin
    stride, pad = 2, 3
    Ho = (H + 2 * pad - KH) // stride + 1
    Wo = (W + 2 * pad - KW) // stride + 1
    assert Ho % 2 == 0 and Wo % 2 == 0, "TODO(synk): odd conv-output sizes unsupported"
    Hp, Wp = Ho // 2, Wo // 2                    # 3x3 / stride-2 / pad-1 maxpool output
    K = KH * KW * Cin
    K2 = 2 * K

    THp = max(1, min(pooled_rows_per_band, Hp))  # pooled rows computed per grid step
    nb = -(-Hp // THp)                           # number of row bands (cdiv)
    R = 2 * THp + 2                              # conv-row slots per band (even)
    S = 4 * THp + 9                              # padded-input rows per band
    P = Wo // 2                                  # width pairs (== Wp)

    # ---- fold BatchNorm (eval mode) into the weights + a single bias row ----
    scale = bn_gamma / jnp.sqrt(bn_var + eps)
    shift = bn_beta - bn_mean * scale
    Wm = (jnp.transpose(conv_w, (2, 3, 1, 0)).reshape(K, Cout) * scale[None, :])
    Wm = Wm.astype(jnp.bfloat16)
    # block-diagonal weight -> matmul output is 128-lane (even|odd width phase) packed
    W2 = jnp.zeros((K2, 2 * Cout), jnp.bfloat16)
    W2 = W2.at[:K, :Cout].set(Wm).at[K:, Cout:].set(Wm)
    shift2 = jnp.tile(shift, 2).reshape(1, 2 * Cout).astype(jnp.float32)

    # ---- input prep: NHWC, spatial pad, bf16, banded rows (1 conv-row overlap) ----
    x = jnp.transpose(x_nchw, (0, 2, 3, 1))
    xp = jnp.pad(x, ((0, 0), (pad, pad), (pad, pad), (0, 0))).astype(jnp.bfloat16)
    row_idx = np.clip(
        4 * THp * np.arange(nb)[:, None] + np.arange(S)[None, :] - 2,
        0, H + 2 * pad - 1)                      # (nb, S), static clipped indices
    xb = xp[:, row_idx]                          # (N, nb, S, W+6, Cin) -- small gather

    # ---- im2col (bf16, NO K padding), banded + width-pair packed ----
    taps = []
    for kh in range(KH):
        for kw in range(KW):
            taps.append(xb[:, :, kh:kh + 2 * R - 1:2, kw:kw + 2 * Wo - 1:2, :])
    Xb = jnp.concatenate(taps, axis=-1)          # (N, nb, R, Wo, K)
    Xb = Xb.reshape(N, nb, R * P, K2)            # pack width pairs into the K axis

    out5 = pl.pallas_call(
        _make_stem_kernel(R, P, THp, Cout),
        out_shape=jax.ShapeDtypeStruct((N, nb, THp, Wp, Cout), jnp.float32),
        grid=(N, nb),
        in_specs=[
            pl.BlockSpec((None, None, R * P, K2), lambda n, b: (n, b, 0, 0)),
            pl.BlockSpec((K2, 2 * Cout), lambda n, b: (0, 0)),
            pl.BlockSpec((1, 2 * Cout), lambda n, b: (0, 0)),
        ],
        out_specs=pl.BlockSpec((None, None, THp, Wp, Cout),
                               lambda n, b: (n, b, 0, 0, 0)),
        compiler_params=pltpu.CompilerParams(
            dimension_semantics=("parallel", "parallel"),
            vmem_limit_bytes=32 * 1024 * 1024),
    )(Xb, W2, shift2)

    out = out5.reshape(N, nb * THp, Wp, Cout)[:, :Hp]   # drop padded garbage rows
    return jnp.transpose(out, (0, 3, 1, 2))             # back to NCHW


# ---------------- pure-JAX reference for sanity check ----------------

def _reference(x, w, gamma, beta, mean, var, eps=1e-5):
    y = jax.lax.conv_general_dilated(
        x, w, window_strides=(2, 2), padding=((3, 3), (3, 3)),
        dimension_numbers=('NCHW', 'OIHW', 'NCHW'))
    scale = gamma / jnp.sqrt(var + eps)
    shift = beta - mean * scale
    y = y * scale[None, :, None, None] + shift[None, :, None, None]
    y = jnp.maximum(y, 0.0)
    y = jax.lax.reduce_window(
        y, -jnp.inf, jax.lax.max,
        window_dimensions=(1, 1, 3, 3), window_strides=(1, 1, 2, 2),
        padding=((0, 0), (0, 0), (1, 1), (1, 1)))
    return y


if __name__ == "__main__":
    key = jax.random.PRNGKey(0)
    k_x, k_w = jax.random.split(key)

    # ResNetBackbone(resnet_type=*, is_smpl=True) stem: conv1 = Conv2d(4, 64, 7, 2, 3)
    N, Cin, H, W = 2, 4, 16, 16
    Cout = 64

    x = jax.random.normal(k_x, (N, Cin, H, W), dtype=jnp.float32)
    # nn.init.normal_(conv.weight, mean=0, std=0.001)
    conv_w = 0.001 * jax.random.normal(k_w, (Cout, Cin, 7, 7), dtype=jnp.float32)
    # BatchNorm2d(64): weight=1, bias=0; running stats (eval mode): mean=0, var=1
    bn_gamma = jnp.ones((Cout,), jnp.float32)
    bn_beta = jnp.zeros((Cout,), jnp.float32)
    bn_mean = jnp.zeros((Cout,), jnp.float32)
    bn_var = jnp.ones((Cout,), jnp.float32)

    fwd = jax.jit(lambda *a: resnet_backbone_stem(*a))
    out = jax.block_until_ready(fwd(x, conv_w, bn_gamma, bn_beta, bn_mean, bn_var))

    ref = jax.block_until_ready(_reference(x, conv_w, bn_gamma, bn_beta, bn_mean, bn_var))
    assert out.shape == ref.shape == (N, Cout, 4, 4), (out.shape, ref.shape)
    # bf16 conv operands -> loosened tolerances vs the f32 reference
    np.testing.assert_allclose(np.asarray(out), np.asarray(ref), atol=2e-3, rtol=2e-2)

    print("KERNEL_OK")
</pallas_src>

<mosaic_0001>
module attributes {stable_mosaic.version = 11 : i64} {
  func.func @kernel(%arg0: i32, %arg1: i32, %arg2: memref<1x1x40x392xbf16, #tpu.memory_space<vmem>>, %arg3: memref<392x128xbf16, #tpu.memory_space<vmem>>, %arg4: memref<1x128xf32, #tpu.memory_space<vmem>>, %arg5: memref<1x1x4x4x64xf32, #tpu.memory_space<vmem>>) attributes {dimension_semantics = [#tpu.dimension_semantics<parallel>, #tpu.dimension_semantics<parallel>], iteration_bounds = array<i64: 2, 1>, scalar_prefetch = 0 : i64, scratch_operands = 0 : i64, tpu.core_type = #tpu.core_type<tc>, window_params = [{transform_indices = @transform_0, window_bounds = array<i64: 1, 1, 40, 392>}, {pipeline_mode = #tpu.pipeline_mode<synchronous>, transform_indices = @transform_1, window_bounds = array<i64: 392, 128>}, {pipeline_mode = #tpu.pipeline_mode<synchronous>, transform_indices = @transform_2, window_bounds = array<i64: 1, 128>}, {transform_indices = @transform_3, window_bounds = array<i64: 1, 1, 4, 4, 64>}]} {
    %c0 = arith.constant 0 : index
    %c0_0 = arith.constant 0 : index
    %c0_1 = arith.constant 0 : index
    %c0_2 = arith.constant 0 : index
    %0 = vector.load %arg2[%c0, %c0_0, %c0_1, %c0_2] : memref<1x1x40x392xbf16, #tpu.memory_space<vmem>>, vector<1x1x40x392xbf16>
    %1 = vector.shape_cast %0 : vector<1x1x40x392xbf16> to vector<40x392xbf16>
    %c0_3 = arith.constant 0 : index
    %c0_4 = arith.constant 0 : index
    %2 = vector.load %arg3[%c0_3, %c0_4] : memref<392x128xbf16, #tpu.memory_space<vmem>>, vector<392x128xbf16>
    %cst = arith.constant dense<0.000000e+00> : vector<40x128xf32>
    %3 = tpu.matmul %1, %2, %cst {dimension_numbers = #tpu.dot_dimension_numbers<[1], [0], [0], [1], [0, 0, 1, 1], [], []>} : vector<40x392xbf16>, vector<392x128xbf16>, vector<40x128xf32> -> vector<40x128xf32>
    %c0_5 = arith.constant 0 : index
    %c0_6 = arith.constant 0 : index
    %4 = vector.load %arg4[%c0_5, %c0_6] : memref<1x128xf32, #tpu.memory_space<vmem>>, vector<1x128xf32>
    %5 = vector.broadcast %4 : vector<1x128xf32> to vector<40x128xf32>
    %6 = arith.addf %3, %5 : vector<40x128xf32>
    %cst_7 = arith.constant 0.000000e+00 : f32
    %7 = vector.broadcast %cst_7 : f32 to vector<40x128xf32>
    %8 = arith.maximumf %6, %7 : vector<40x128xf32>
    %9 = vector.shape_cast %8 : vector<40x128xf32> to vector<10x4x128xf32>
    %10 = vector.extract_strided_slice %9 {offsets = [0, 0, 0], sizes = [10, 4, 64], strides = [1, 1, 1]} : vector<10x4x128xf32> to vector<10x4x64xf32>
    %11 = vector.extract_strided_slice %9 {offsets = [0, 0, 64], sizes = [10, 4, 64], strides = [1, 1, 1]} : vector<10x4x128xf32> to vector<10x4x64xf32>
    %12 = vector.extract_strided_slice %11 {offsets = [0, 0, 0], sizes = [10, 1, 64], strides = [1, 1, 1]} : vector<10x4x64xf32> to vector<10x1x64xf32>
    %13 = vector.extract_strided_slice %11 {offsets = [0, 0, 0], sizes = [10, 3, 64], strides = [1, 1, 1]} : vector<10x4x64xf32> to vector<10x3x64xf32>
    %14 = tpu.concatenate %12, %13 in 1 : vector<10x1x64xf32>, vector<10x3x64xf32> -> vector<10x4x64xf32>
    %15 = arith.maximumf %10, %11 : vector<10x4x64xf32>
    %16 = arith.maximumf %15, %14 : vector<10x4x64xf32>
    %c0_i32 = arith.constant 0 : i32
    %17 = arith.cmpi eq, %arg1, %c0_i32 : i32
    %cst_8 = arith.constant -3.000000e+38 : f32
    %cst_9 = arith.constant 3.000000e+38 : f32
    %18 = arith.select %17, %cst_8, %cst_9 : f32
    %19 = vector.extract_strided_slice %16 {offsets = [0, 0, 0], sizes = [1, 4, 64], strides = [1, 1, 1]} : vector<10x4x64xf32> to vector<1x4x64xf32>
    %20 = vector.broadcast %18 : f32 to vector<1x4x64xf32>
    %21 = arith.minimumf %19, %20 : vector<1x4x64xf32>
    %22 = vector.extract_strided_slice %16 {offsets = [1, 0, 0], sizes = [9, 4, 64], strides = [1, 1, 1]} : vector<10x4x64xf32> to vector<9x4x64xf32>
    %23 = tpu.concatenate %21, %22 in 0 : vector<1x4x64xf32>, vector<9x4x64xf32> -> vector<10x4x64xf32>
    %24 = vector.shape_cast %23 : vector<10x4x64xf32> to vector<5x2x4x64xf32>
    %25 = vector.extract_strided_slice %24 {offsets = [0, 0, 0, 0], sizes = [5, 1, 4, 64], strides = [1, 1, 1, 1]} : vector<5x2x4x64xf32> to vector<5x1x4x64xf32>
    %26 = vector.shape_cast %25 : vector<5x1x4x64xf32> to vector<5x4x64xf32>
    %27 = vector.extract_strided_slice %24 {offsets = [0, 1, 0, 0], sizes = [5, 1, 4, 64], strides = [1, 1, 1, 1]} : vector<5x2x4x64xf32> to vector<5x1x4x64xf32>
    %28 = vector.shape_cast %27 : vector<5x1x4x64xf32> to vector<5x4x64xf32>
    %29 = vector.extract_strided_slice %26 {offsets = [0, 0, 0], sizes = [4, 4, 64], strides = [1, 1, 1]} : vector<5x4x64xf32> to vector<4x4x64xf32>
    %30 = vector.extract_strided_slice %28 {offsets = [0, 0, 0], sizes = [4, 4, 64], strides = [1, 1, 1]} : vector<5x4x64xf32> to vector<4x4x64xf32>
    %31 = arith.maximumf %29, %30 : vector<4x4x64xf32>
    %32 = vector.extract_strided_slice %26 {offsets = [1, 0, 0], sizes = [4, 4, 64], strides = [1, 1, 1]} : vector<5x4x64xf32> to vector<4x4x64xf32>
    %33 = arith.maximumf %31, %32 : vector<4x4x64xf32>
    %c0_10 = arith.constant 0 : index
    %c0_11 = arith.constant 0 : index
    %c0_12 = arith.constant 0 : index
    %c0_13 = arith.constant 0 : index
    %c0_14 = arith.constant 0 : index
    %34 = vector.load %arg5[%c0_10, %c0_11, %c0_12, %c0_13, %c0_14] : memref<1x1x4x4x64xf32, #tpu.memory_space<vmem>>, vector<1x1x4x4x64xf32>
    %35 = vector.shape_cast %34 : vector<1x1x4x4x64xf32> to vector<4x4x64xf32>
    %36 = vector.shape_cast %33 : vector<4x4x64xf32> to vector<1x1x4x4x64xf32>
    tpu.vector_store %arg5[%c0_10, %c0_11, %c0_12, %c0_13, %c0_14], %36 {strides = array<i32>} : memref<1x1x4x4x64xf32, #tpu.memory_space<vmem>>, vector<1x1x4x4x64xf32>,
    return
  }
  func.func @transform_0(%arg0: i32, %arg1: i32) -> (i32, i32, i32, i32) {
    %c0_i32 = arith.constant 0 : i32
    %c0_i32_0 = arith.constant 0 : i32
    %c0_i32_1 = arith.constant 0 : i32
    return %arg0, %arg1, %c0_i32, %c0_i32_0 : i32, i32, i32, i32
  }
  func.func @transform_1(%arg0: i32, %arg1: i32) -> (i32, i32) {
    %c0_i32 = arith.constant 0 : i32
    %c0_i32_0 = arith.constant 0 : i32
    %c0_i32_1 = arith.constant 0 : i32
    return %c0_i32, %c0_i32_0 : i32, i32
  }
  func.func @transform_2(%arg0: i32, %arg1: i32) -> (i32, i32) {
    %c0_i32 = arith.constant 0 : i32
    %c0_i32_0 = arith.constant 0 : i32
    %c0_i32_1 = arith.constant 0 : i32
    return %c0_i32, %c0_i32_0 : i32, i32
  }
  func.func @transform_3(%arg0: i32, %arg1: i32) -> (i32, i32, i32, i32, i32) {
    %c0_i32 = arith.constant 0 : i32
    %c0_i32_0 = arith.constant 0 : i32
    %c0_i32_1 = arith.constant 0 : i32
    %c0_i32_2 = arith.constant 0 : i32
    return %arg0, %arg1, %c0_i32, %c0_i32_0, %c0_i32_1 : i32, i32, i32, i32, i32
  }
}

</mosaic_0001>

<bundles_post_ra>
// kernel: tile.8
= control target key start
LH: loop header
LB: loop body
LE: loop exit
PB: predicated region body
PF: predicated region fallthrough
CT: control target
= control target key end

     0   :  { %s22_s0 = inlined_call_operand.vmem [shape: f32[64], index: 0, kind: input, shape index: {}]   ;;  %s23_s1 = inlined_call_operand.vmem [shape: f32[2,64], index: 1, kind: output, shape index: {}]  }
   0x1   :  { %v4_v0 = vld [vmem:[%s22_s0] ss:$0 sm:$0xff] }
   0x2   :  { %5 = vst [vmem:[%s23_s1] sm:$0x3] %v4_v0 }

// kernel: tile.9
= control target key start
LH: loop header
LB: loop body
LE: loop exit
PB: predicated region body
PF: predicated region fallthrough
CT: control target
= control target key end

     0   :  { %vm8_vm0 = vcmask 523264   ;;  %vm14_vm1 = vcmask 1048064   ;;  %s42_s0 = inlined_call_operand.vmem [shape: f32[2,64], index: 0, kind: input, shape index: {}]   ;;  %s43_s1 = inlined_call_operand.vmem [shape: f32[1,128], index: 1, kind: output, shape index: {}]  }
   0x1   :  { %v5_v0 = vld [vmem:[%s42_s0] sm:$0x3]  ;;  %s25_s0 = smov 64  }
   0x2   :  { %6 = vst [vmem:[#allocation1] sm:$0x3] %v5_v0 }
   0x9   :  { %v11_v1 = vld [vmem:[#allocation1 + $0x1] sm:$0x1]   ;;  %v7_v2 = vld [vmem:[#allocation1] sm:$0x1]  }
   0xa   :  { %12 = vrot.lane.b32.xlu0 %v11_v1, %s25_s0  ;;  %9 = vst.msk [vmem:[#allocation0] sm:$0x1] %vm8_vm0, %v7_v2  }
  0x7c   :  { %v13_v3 = vpop.permute.xlu0 %12  }
  0x7d   :  { %15 = vst.msk [vmem:[#allocation0] sm:$0x1] %vm14_vm1, %v13_v3  }
  0x84   :  { %v20_v4 = vld [vmem:[#allocation0] sm:$0x1] }
  0x85   :  { %23 = vst [vmem:[%s43_s1] sm:$0x1] %v20_v4 }

// kernel: _lambda_.1
= control target key start
LH: loop header
LB: loop body
LE: loop exit
PB: predicated region body
PF: predicated region fallthrough
CT: control target
= control target key end

     0   :  { %8 = vsyncpa [#allocation3], 0  ;;  %s1449_s0 = inlined_call_operand.vmem [shape: bf16[2,1,40,392], index: 0, kind: input, shape index: {}]   ;;  %s1450_s1 = inlined_call_operand.vmem [shape: bf16[392,128], index: 1, kind: input, shape index: {}]   ;;  %s1451_s2 = inlined_call_operand.vmem [shape: f32[1,128], index: 2, kind: input, shape index: {}]   ;;  %s1452_s3 = inlined_call_operand.hbm [shape: f32[2,1,4,4,64], index: 3, kind: output, shape index: {}]  }
   0x1   :  { %10 = vsyncpa [#allocation3 + $0x1], 0  ;;  %s1120_s12 = smov 0   ;;  %s1122_s13 = smov 0  }
   0x2   :  { %s1124_s14 = smov 0   ;;  %s1126_s15 = smov 0  }
   0x3   :  { %s1128_s16 = smov 0   ;;  %s1130_s17 = smov 0  }
   0x4 LB: > { %s830_s18 = sadd.s32 4294967295, %s1094_s17   ;;  %s831_s19 = sadd.s32 4294967294, %s1094_s17   ;;  %s1094_s17 = sphi %s1130_s17, %s16_s17   ;;  %s1090_s16 = sphi %s1128_s16, %s1459_s16   ;;  %s1086_s15 = sphi %s1126_s15, %s1458_s15   ;;  %s1082_s14 = sphi %s1124_s14, %s1457_s14   ;;  %s1078_s13 = sphi %s1122_s13, %s1456_s13   ;;  %s1074_s12 = sphi %s1120_s12, %s1455_s12  }
   0x5   : > { %s28_s20 = sadd.s32 1, %s1090_s16  ;;  %s107_s21 = sadd.s32 1, %s1082_s14 }
   0x6   : > { %p30_p0 = scmp.ge.s32.totalorder %s28_s20, 2  ;;  %p117_p1 = scmp.ne.s32.totalorder %s1082_s14, %s1078_s13 }
   0x7   : > { %p118_p2 = scmp.eq.s32.totalorder %s830_s18, 1  ;;  %p123_p3 = scmp.ne.s32.totalorder %s1078_s13, %s1074_s12 }
   0x8   : > { %s1461_s20 = smov (%p30_p0, %s28_s20), 0  ;;  %p124_p5 = scmp.eq.s32.totalorder %s831_s19, 1 }
   0x9   : > { %p1160_p4 = por %p118_p2, %p117_p1  ;;  %s102_s23 = ssub.s32 %s1090_s16, %s1461_s20 }
   0xa   : > { %p834_p6 = scmp.ge.s32.totalorder %s1094_s17, 1  ;;  %p105_p7 = scmp.eq.s32.totalorder %s102_s23, 0 }
   0xb   : > { %p1167_p8 = por %p124_p5, %p123_p3  ;;  %p160_p9 = scmp.lt.s32.totalorder %s1094_s17, 3 }
   0xc   : > { %s1173_s25 = scalar_select %p105_p7, %s1082_s14, %s107_s21  }
   0xd   : > { %p161_p10 = pnand %p834_p6, %p160_p9 }
   0xe   : > { %p188_p11 = scmp.lt.s32.totalorder (!%p161_p10), %s1086_s15, 1  ;;  %s1097_s5 = smov (!%p161_p10), 64  }
   0xf   : > { %164 = sbr.rel (%p161_p10) target bundleno = 426 (0x1aa), region = 32  ;;  %s185_s6 = sand.u32 (!%p161_p10), 1, %s1078_s13  }
  0x10   : > { %s883_s9 = sshll.u32 (!%p161_p10), %s1086_s15, 8  ;;  %s1402_s21 = scalar_lea.sflag (!%p161_p10), [#allocation3], %s185_s6 }
  0x11   : > { %s1394_s19 = scalar_lea.hbm (!%p161_p10), %s1452_s3, %s883_s9 }
  0x14   : > { %v977_v0 = vld [vmem:[%s1450_s1 + $0x78] sm:$0xff]   ;;  %v1096_v1 = vmov 0   ;;  %v980_v4 = vld [vmem:[%s1450_s1 + $0x70] sm:$0xff]   ;;  %v983_v7 = vld [vmem:[%s1450_s1 + $0x68] sm:$0xff]   ;;  %s189_s8 = scalar_select %p188_p11, %s1086_s15, 1  ;;  %vm462_vm0 = vcmask 64512  }
  0x15   : > { %532 = vmatprep.subr.bf16.mxu1 %v1096_v1  ;;  %v978_v2 = vld [vmem:[%s1450_s1 + $0xb8] sm:$0xff]   ;;  %884 = vmatprep.subr.bf16.mxu0 %v977_v0  ;;  %v981_v5 = vld [vmem:[%s1450_s1 + $0xb0] sm:$0xff]   ;;  %v984_v8 = vld [vmem:[%s1450_s1 + $0xa8] sm:$0xff]   ;;  %vm472_vm1 = vcmask 1043456   ;;  %vm624_vm2 = vcmask 1040384   ;;  %vm727_vm3 = vcmask 519168  }
  0x16   : > { %v979_v3 = vld [vmem:[%s1450_s1 + $0x38] sm:$0xff]   ;;  %533 = vmatpush1.bf16.msra.mxu1 %v978_v2  ;;  %v982_v6 = vld [vmem:[%s1450_s1 + $0x30] sm:$0xff]   ;;  %v985_v9 = vld [vmem:[%s1450_s1 + $0x28] sm:$0xff]   ;;  %s918_s23 = smul.u32 80, %s189_s8 }
  0x17   : > { %885 = vmatpush3.bf16.msra.mxu0 %v979_v3  ;;  %534 = vmatprep.subr.bf16.mxu1 %v1096_v1  ;;  %v986_v10 = vld [vmem:[%s1450_s1 + $0x60] sm:$0xff]   ;;  %v989_v13 = vld [vmem:[%s1450_s1 + $0x58] sm:$0xff]   ;;  %v992_v16 = vld [vmem:[%s1450_s1 + $0x50] sm:$0xff]  }
  0x18   : > { %886 = vmatprep.subr.bf16.mxu0 %v980_v4  ;;  %v987_v11 = vld [vmem:[%s1450_s1 + $0xa0] sm:$0xff]   ;;  %v990_v14 = vld [vmem:[%s1450_s1 + $0x98] sm:$0xff]   ;;  %v993_v17 = vld [vmem:[%s1450_s1 + $0x90] sm:$0xff]   ;;  %s1243_s7 = scalar_lea.vmem %s1449_s0, %s918_s23  ;;  %s1098_s23 = smov [#allocation2]  }
  0x19   : > { %v988_v12 = vld [vmem:[%s1450_s1 + $0x20] sm:$0xff]   ;;  %v991_v15 = vld [vmem:[%s1450_s1 + $0x18] sm:$0xff]   ;;  %v994_v18 = vld [vmem:[%s1450_s1 + $0x10] sm:$0xff]   ;;  %s1022_s26 = sshll.u32 %s1098_s23, 4  ;;  %s1023_s26 = int_to_ptr.vmem [resolvable:$false] %s1022_s26 }
  0x1a   : > { %535 = vmatpush1.bf16.msra.mxu1 %v981_v5  ;;  %v995_v19 = vld [vmem:[%s1450_s1 + $0x48] sm:$0xff]   ;;  %v998_v22 = vld [vmem:[%s1450_s1 + $0x40] sm:$0xff]   ;;  %s1024_s27 = scalar_lea.vmem %s1023_s26, 512 }
  0x1b   : > { %887 = vmatpush3.bf16.msra.mxu0 %v982_v6  ;;  %536 = vmatprep.subr.bf16.mxu1 %v1096_v1  ;;  %v996_v20 = vld [vmem:[%s1450_s1 + $0x88] sm:$0xff]   ;;  %v1003_v23 = vld [vmem:[%s1243_s7 + $0x4] ss:$16 sps:$4 sm:$0xff]   ;;  %v1004_v27 = vld [vmem:[%s1450_s1 + $0xc0] ss:$0 sps:$4 sm:$0xff]  }
  0x1c   : > { %888 = vmatprep.subr.bf16.mxu0 %v983_v7  ;;  %v997_v21 = vld [vmem:[%s1450_s1 + $0x8] sm:$0xff]   ;;  %v999_v24 = vld [vmem:[%s1450_s1 + $0x80] sm:$0xff]   ;;  %508 = vmatprep.mubr.bf16.mxu0 %v1003_v23  ;;  %v474_v29 = vsel %vm472_vm1, %v1004_v27, 0 }
  0x1d   : > { %v1007_v25 = vld [vmem:[%s1243_s7 + $0xc] ss:$16 sps:$4 sm:$0xff]   ;;  %v1000_v26 = vld [vmem:[%s1450_s1] sm:$0xff]   ;;  %v1005_v31 = vld [vmem:[%s1243_s7 + $0x8] ss:$16 sps:$4 sm:$0xff]  }
  0x1e   : > { %537 = vmatpush1.bf16.msra.mxu1 %v984_v8  ;;  %875 = vmatprep.mubr.msk.bf16.mxu1 %vm462_vm0, %v1007_v25  ;;  %v1001_v28 = vld [vmem:[%s1243_s7] ss:$16 sps:$4 sm:$0xff]   ;;  %v1008_v30 = vld [vmem:[%s1243_s7 + $0x24] ss:$16 sps:$4 sm:$0xff]   ;;  %v1011_v32 = vld [vmem:[%s1243_s7 + $0x2c] ss:$16 sps:$4 sm:$0xff]  }
  0x1f   : > { %889 = vmatpush3.bf16.msra.mxu0 %v985_v9  ;;  %538 = vmatprep.subr.bf16.mxu1 %v1096_v1  ;;  %v206_v33 = vld [vmem:[%s1243_s7 + $0x40] sm:$0xff]  ;;  %v207_v36 = vld [vmem:[%s1243_s7 + $0x48] sm:$0xff] }
  0x20   : > { %890 = vmatprep.subr.bf16.mxu0 %v986_v10  ;;  %v1010_v34 = vld [vmem:[%s1243_s7 + $0x20] ss:$16 sps:$4 sm:$0xff]   ;;  %v847_v35 = vcombine.high %v206_v33, %v206_v33  ;;  %v1013_v37 = vld [vmem:[%s1243_s7 + $0x28] ss:$16 sps:$4 sm:$0xff]   ;;  %v849_v38 = vcombine.high %v207_v36, %v207_v36  ;;  %v846_v39 = vcombine.low %v206_v33, %v206_v33  ;;  %v848_v40 = vcombine.low %v207_v36, %v207_v36  ;;  %s835_s7 = sshll.u32 %s185_s6, 4 }
  0x21   : > { %v1282_v43 = vld [vmem:[%s1451_s2] ss:$0 sm:$0xff]  ;;  %s1376_s8 = scalar_lea.vmem [#allocation2], %s835_s7 }
  0x22   : > { %539 = vmatpush1.bf16.msra.mxu1 %v987_v11  ;;  %s748_s10 = sshll.u32 %s1376_s8, 4  ;;  %s1396_s10 = int_to_ptr.vmem [resolvable:$true] %s748_s10 }
  0x23   : > { %891 = vmatpush3.bf16.msra.mxu0 %v988_v12  ;;  %540 = vmatprep.subr.bf16.mxu1 %v1096_v1  ;;  %s1018_s15 = scalar_lea.vmem %s1396_s10, 256  ;;  %p1025_p1 = scmp.lt.s32.totalorder %s1396_s10, %s1023_s26 }
  0x24   : > { %892 = vmatprep.subr.bf16.mxu0 %v989_v13  ;;  %p1019_p12 = scmp.ne.s32.totalorder %s1396_s10, %s1018_s15  ;;  %p1026_p2 = scmp.lt.s32.totalorder %s1024_s27, %s1018_s15 }
  0x26   : > { %541 = vmatpush1.bf16.msra.mxu1 %v990_v14  ;;  %p1020_p13 = pnand %p1019_p12, %p1160_p4  ;;  %p1027_p3 = por %p1026_p2, %p1025_p1 }
  0x27   : > { %893 = vmatpush3.bf16.msra.mxu0 %v991_v15  ;;  %542 = vmatprep.subr.bf16.mxu1 %v1096_v1 }
  0x28   : > { %894 = vmatprep.subr.bf16.mxu0 %v992_v16  ;;  %p1021_p0 = pneg %p1020_p13 }
  0x2a   : > { %543 = vmatpush1.bf16.msra.mxu1 %v993_v17  ;;  %p1028_p5 = pnand %p1027_p3, %p1021_p0 }
  0x2b   : > { %895 = vmatpush3.bf16.msra.mxu0 %v994_v18  ;;  %544 = vmatprep.subr.bf16.mxu1 %v1096_v1 }
  0x2c   : > { %896 = vmatprep.subr.bf16.mxu0 %v995_v19 }
  0x2e   : > { %545 = vmatpush1.bf16.msra.mxu1 %v996_v20 }
  0x2f   : > { %897 = vmatpush3.bf16.msra.mxu0 %v997_v21  ;;  %546 = vmatprep.subr.bf16.mxu1 %v1096_v1 }
  0x30   : > { %898 = vmatprep.subr.bf16.mxu0 %v998_v22 }
  0x32   : > { %547 = vmatpush1.bf16.msra.mxu1 %v999_v24 }
  0x33   : > { %899 = vmatpush3.bf16.msra.mxu0 %v1000_v26  ;;  %562 = vmatprep.subr.bf16.mxu1 %v1096_v1 }
  0x36   : > { %509 = vmatmul.mubr.bf16.vlgmr.msra.gmra.mxu0 %v1001_v28  ;;  %563 = vmatpush2.bf16.msra.mxu1 %v474_v29 }
  0x37   : > { %516 = vmatprep.mubr.bf16.mxu0 %v1008_v30 }
  0x39   : > { %565 = vmatmul.mubr.bf16.vlgmr.msra.gmra.mxu1 %v1005_v31 }
  0x3a   : > { %876 = vmatprep.mubr.msk.bf16.mxu1 %vm462_vm0, %v1011_v32 }
  0x3e   : > { %517 = vmatmul.mubr.bf16.gmra.mxu0 %v1010_v34 }
  0x3f   : > { %524 = vmatprep.mubr.bf16.mxu0 %v847_v35 }
  0x41   : > { %573 = vmatmul.mubr.bf16.gmra.mxu1 %v1013_v37 }
  0x42   : > { %877 = vmatprep.mubr.msk.bf16.mxu1 %vm462_vm0, %v849_v38 }
  0x46   : > { %525 = vmatmul.mubr.bf16.gmra.mxu0 %v846_v39 }
  0x49   : > { %581 = vmatmul.mubr.bf16.gmra.mxu1 %v848_v40 }
  0xf6   : > { %v900_v41 = vpop.f32.mrf.mxu0 }
  0xf8   : > { %v901_v42 = vpop.f32.mrf.mxu0 }
  0xf9   : > { %v902_v44 = vadd.f32 %v901_v42, %v900_v41  ;;  %v566_v45 = vpop.f32.mrf.mxu1 }
  0xfa   : > { %v903_v46 = vpop.f32.mrf.mxu0 }
  0xfb   : > { %v511_v47 = vadd.f32 %v902_v44, %v1282_v43  ;;  %v568_v48 = vpop.f32.mrf.mxu1 }
  0xfc   : > { %v904_v49 = vpop.f32.mrf.mxu0 }
  0xfd   : > { %v567_v50 = vadd.f32 %v566_v45, %v511_v47  ;;  %v905_v51 = vadd.f32 %v904_v49, %v903_v46  ;;  %v569_v52 = vpop.f32.mrf.mxu1 }
  0xfe   : > { %v906_v53 = vpop.f32.mrf.mxu0 }
  0xff   : > { %v1285_v54 = vmax.f32 %v567_v50, 0.0  ;;  %v514_v55 = vadd.f32 %v905_v51, %v1282_v43  ;;  %v571_v56 = vpop.f32.mrf.mxu1 }
 0x100   : > { %v907_v57 = vpop.f32.mrf.mxu0 }
 0x101   : > { %v570_v58 = vadd.f32 %v569_v52, %v514_v55  ;;  %v908_v59 = vadd.f32 %v907_v57, %v906_v53  ;;  %634 = vrot.lane.b32.xlu0 %v1285_v54, %s1097_s5  ;;  %v574_v60 = vpop.f32.mrf.mxu1  ;;  %v1295_v0 = vcombine.high %v1285_v54, %v1285_v54  ;;  %v606_v3 = vrot.slane %v1285_v54, 7 }
 0x102   : > { %v909_v61 = vpop.f32.mrf.mxu0 }
 0x103   : > { %v1290_v62 = vmax.f32 %v570_v58, 0.0  ;;  %v519_v63 = vadd.f32 %v908_v59, %v1282_v43  ;;  %v576_v1 = vpop.f32.mrf.mxu1  ;;  %v625_v10 = vsel %vm624_vm2, %v1285_v54, %v606_v3  ;;  %v607_v12 = vrot.slane %v1295_v0, 7 }
 0x104   : > { %v910_v2 = vpop.f32.mrf.mxu0 }
 0x105   : > { %638 = vrot.lane.b32.xlu1 %v1290_v62, %s1097_s5  ;;  %636 = vrot.lane.b32.xlu0 %v1295_v0, %s1097_s5  ;;  %v577_v4 = vpop.f32.mrf.mxu1  ;;  %v911_v6 = vadd.f32 %v910_v2, %v909_v61  ;;  %v575_v7 = vadd.f32 %v574_v60, %v519_v63  ;;  %v1304_v8 = vcombine.high %v1290_v62, %v1290_v62  ;;  %v608_v11 = vrot.slane %v1290_v62, 7 }
 0x106   : > { %v912_v5 = vpop.f32.mrf.mxu0  ;;  %v626_v20 = vsel %vm624_vm2, %v1295_v0, %v607_v12 }
 0x107   : > { %v579_v9 = vpop.f32.mrf.mxu1  ;;  %v1313_v16 = vmax.f32 %v575_v7, 0.0  ;;  %v522_v17 = vadd.f32 %v911_v6, %v1282_v43  ;;  %v627_v19 = vsel %vm624_vm2, %v1290_v62, %v608_v11  ;;  %v609_v28 = vrot.slane %v1304_v8, 7 }
 0x108   : > { %v913_v13 = vpop.f32.mrf.mxu0 }
 0x109   : > { %640 = vrot.lane.b32.xlu1 %v1304_v8, %s1097_s5  ;;  %679 = vrot.lane.b32.xlu0 %v625_v10, %s1097_s5  ;;  %v582_v14 = vpop.f32.mrf.mxu1  ;;  %v578_v23 = vadd.f32 %v577_v4, %v522_v17  ;;  %v1324_v24 = vcombine.high %v1313_v16, %v1313_v16  ;;  %v914_v26 = vadd.f32 %v913_v13, %v912_v5  ;;  %v610_v27 = vrot.slane %v1313_v16, 7 }
 0x10a   : > { %v915_v15 = vpop.f32.mrf.mxu0  ;;  %v628_v31 = vsel %vm624_vm2, %v1304_v8, %v609_v28 }
 0x10b   : > { %v584_v18 = vpop.f32.mrf.mxu1  ;;  %v1332_v29 = vmax.f32 %v578_v23, 0.0  ;;  %v629_v30 = vsel %vm624_vm2, %v1313_v16, %v610_v27  ;;  %v527_v32 = vadd.f32 %v914_v26, %v1282_v43  ;;  %v611_v36 = vrot.slane %v1324_v24, 7 }
 0x10c   : > { %v916_v21 = vpop.f32.mrf.mxu0 }
 0x10d   : > { %683 = vrot.lane.b32.xlu1 %v627_v19, %s1097_s5  ;;  %681 = vrot.lane.b32.xlu0 %v626_v20, %s1097_s5  ;;  %v585_v22 = vpop.f32.mrf.mxu1  ;;  %v1343_v33 = vcombine.high %v1332_v29, %v1332_v29  ;;  %v583_v34 = vadd.f32 %v582_v14, %v527_v32  ;;  %v612_v35 = vrot.slane %v1332_v29, 7  ;;  %v630_v39 = vsel %vm624_vm2, %v1324_v24, %v611_v36 }
 0x10f   : > { %v586_v25 = vpop.f32.mrf.mxu1  ;;  %v1351_v37 = vmax.f32 %v583_v34, 0.0  ;;  %v631_v38 = vsel %vm624_vm2, %v1332_v29, %v612_v35  ;;  %v613_v40 = vrot.slane %v1343_v33, 7 }
 0x111   : > { %644 = vrot.lane.b32.xlu1 %v1324_v24, %s1097_s5  ;;  %642 = vrot.lane.b32.xlu0 %v1313_v16, %s1097_s5  ;;  %v632_v41 = vsel %vm624_vm2, %v1343_v33, %v613_v40  ;;  %v614_v42 = vrot.slane %v1351_v37, 7 }
 0x113   : > { %v633_v43 = vsel %vm624_vm2, %v1351_v37, %v614_v42 }
 0x115   : > { %687 = vrot.lane.b32.xlu1 %v629_v30, %s1097_s5  ;;  %685 = vrot.lane.b32.xlu0 %v628_v31, %s1097_s5 }
 0x119   : > { %648 = vrot.lane.b32.xlu1 %v1343_v33, %s1097_s5  ;;  %646 = vrot.lane.b32.xlu0 %v1332_v29, %s1097_s5 }
 0x11d   : > { %691 = vrot.lane.b32.xlu1 %v631_v38, %s1097_s5  ;;  %689 = vrot.lane.b32.xlu0 %v630_v39, %s1097_s5 }
 0x121   : > { %650 = vrot.lane.b32.xlu1 %v1351_v37, %s1097_s5  ;;  %693 = vrot.lane.b32.xlu0 %v632_v41, %s1097_s5 }
 0x125   : > { %695 = vrot.lane.b32.xlu1 %v633_v43, %s1097_s5 }
 0x173   : > { %v635_v44 = vpop.permute.xlu0 %634 }
 0x174   : > { %v661_v47 = vmax.f32 %v1285_v54, %v635_v44 }
 0x177   : > { %v639_v45 = vpop.permute.xlu1 %638  ;;  %v637_v46 = vpop.permute.xlu0 %636 }
 0x178   : > { %v662_v51 = vmax.f32 %v1295_v0, %v637_v46  ;;  %v663_v55 = vmax.f32 %v1290_v62, %v639_v45 }
 0x17b   : > { %v641_v48 = vpop.permute.xlu1 %640  ;;  %v680_v49 = vpop.permute.xlu0 %679 }
 0x17c   : > { %v706_v50 = vmax.f32 %v661_v47, %v680_v49  ;;  %v664_v63 = vmax.f32 %v1304_v8, %v641_v48 }
 0x17e   : > { %v718_v56 = vmin.f32 %v706_v50, -3e+38 }
 0x17f   : > { %v684_v52 = vpop.permute.xlu1 %683  ;;  %v682_v53 = vpop.permute.xlu0 %681 }
 0x180   : > { %v707_v57 = vmax.f32 %v662_v51, %v682_v53  ;;  %v708_v58 = vmax.f32 %v663_v55, %v684_v52 }
 0x182   : > { %v719_v59 = vmax.f32 %v718_v56, %v707_v57 }
 0x183   : > { %v645_v60 = vpop.permute.xlu1 %644  ;;  %v643_v61 = vpop.permute.xlu0 %642 }
 0x184   : > { %v723_v54 = vmax.f32 %v719_v59, %v708_v58  ;;  %v665_v1 = vmax.f32 %v1313_v16, %v643_v61  ;;  %v666_v8 = vmax.f32 %v1324_v24, %v645_v60 }
 0x186   : > { %728 = vst.msk [vmem:[%s1376_s8] sm:$0xf] %vm727_vm3, %v723_v54 }
 0x187   : > { %v688_v0 = vpop.permute.xlu1 %687  ;;  %v686_v62 = vpop.permute.xlu0 %685 }
 0x188   : > { %v709_v2 = vmax.f32 %v664_v63, %v686_v62  ;;  %v710_v3 = vmax.f32 %v665_v1, %v688_v0 }
 0x18a   : > { %v720_v4 = vmax.f32 %v708_v58, %v709_v2 }
 0x18b   : > { %v649_v5 = vpop.permute.xlu1 %648  ;;  %v647_v6 = vpop.permute.xlu0 %646 }
 0x18c   : > { %v724_v7 = vmax.f32 %v720_v4, %v710_v3  ;;  %v667_v11 = vmax.f32 %v1332_v29, %v647_v6  ;;  %v668_v13 = vmax.f32 %v1343_v33, %v649_v5 }
 0x18e   : > { %729 = vst.msk [vmem:[%s1376_s8 + $0x4] sm:$0xf] %vm727_vm3, %v724_v7 }
 0x18f   : > { %v692_v9 = vpop.permute.xlu1 %691  ;;  %v690_v10 = vpop.permute.xlu0 %689 }
 0x190   : > { %v711_v12 = vmax.f32 %v666_v8, %v690_v10  ;;  %v712_v14 = vmax.f32 %v667_v11, %v692_v9 }
 0x192   : > { %v721_v15 = vmax.f32 %v710_v3, %v711_v12 }
 0x193   : > { %v651_v16 = vpop.permute.xlu1 %650  ;;  %v694_v17 = vpop.permute.xlu0 %693 }
 0x194   : > { %v725_v18 = vmax.f32 %v721_v15, %v712_v14  ;;  %v713_v19 = vmax.f32 %v668_v13, %v694_v17  ;;  %v669_v20 = vmax.f32 %v1351_v37, %v651_v16 }
 0x196   : > { %730 = vst.msk [vmem:[%s1376_s8 + $0x8] sm:$0xf] %vm727_vm3, %v725_v18  ;;  %v722_v22 = vmax.f32 %v712_v14, %v713_v19 }
 0x197   : > { %v696_v21 = vpop.permute.xlu1 %695 }
 0x198   : > { %v714_v23 = vmax.f32 %v669_v20, %v696_v21 }
 0x19a   : > { %v726_v24 = vmax.f32 %v722_v22, %v714_v23 }
 0x19c   : > { %731 = vst.msk [vmem:[%s1376_s8 + $0xc] sm:$0xf] %vm727_vm3, %v726_v24 }
 0x19d   : > { %1031 = shalt.err (!%p1028_p5)
}
 0x19e   : > { %s1032_s28 = scalar_lea.hbm %s1394_s19, 256  ;;  %s1036_s4 = scalar_lea.hbm %s1452_s3, 512 }
 0x19f   : > { %p1033_p6 = scmp.ne.s32.totalorder %s1394_s19, %s1032_s28  ;;  %p1037_p10 = scmp.lt.s32.totalorder %s1394_s19, %s1452_s3 }
 0x1a0   : > { %p1038_p11 = scmp.lt.s32.totalorder %s1036_s4, %s1032_s28 }
 0x1a1   : > { %p1034_p7 = pnand %p1033_p6, %p1160_p4 }
 0x1a2   : > { %p1039_p12 = por %p1038_p11, %p1037_p10 }
 0x1a3   : > { %p1035_p9 = pneg %p1034_p7 }
 0x1a5   : > { %p1040_p13 = pnand %p1039_p12, %p1035_p9 }
 0x1a7   : > { %1043 = shalt.err (!%p1040_p13)
}
 0x1a8   : > { %s1099_s8 = smov 4  }
 0x1a9   : > { %919 = dma.vmem_to_hbm [thread:$0]  (%p1160_p4), %s1396_s10, 256, %s1394_s19, %s1402_s21, %s1097_s5, %s1097_s5, %s1099_s8  }
 0x1aa PF: > { %p925_p0 = scmp.ge.s32.totalorder %s1094_s17, 2  ;;  %s763_s9 = sand.u32 1, %s1074_s12  }
 0x1ab   : > { %s764_s11 = scalar_lea.sflag [#allocation3], %s763_s9 }
 0x1ac   : > { %p922_p1 = pnand %p925_p0, %p1167_p8 }
 0x1ae   : > { %p923_p2 = pneg %p922_p1 }
 0x1b0   : > { %1069 = dma.done.wait (%p923_p2), %s764_s11, 256  }
 0x1b1   : > { %1071 = vsyncadd (%p923_p2), %s764_s11, 4294967040  ;;  %s16_s17 = sadd.s32 1, %s1094_s17   ;;  %s1455_s12 = smov %s1078_s13 }
 0x1b2   : > { %p13_p3 = scmp.ge.s32.totalorder %s16_s17, 4   ;;  %s1456_s13 = smov %s1082_s14 }
 0x1b3   : > { %s1457_s14 = smov %s1173_s25  ;;  %s1458_s15 = smov %s1090_s16 }
 0x1b4   : > { %s1459_s16 = smov %s1461_s20  ;;  %15 = sbr.rel (!%p13_p3) target bundleno = 4 (0x4), region = 67 }
 0x1b9   :  { %769 = vsyncpa [#allocation3], 1 }
 0x1ba   :  { %771 = vsyncpa [#allocation3 + $0x1], 1 }

</bundles_post_ra>
